<compile_context>
chip_gen: v6e
topology: v6e:2x2x1
jax: 0.10.0
libtpu: 0.0.40
codegen_flags: <defaults>
</compile_context>

<pallas_src>
import jax
import jax.numpy as jnp
from jax.experimental import pallas as pl
from jax.experimental.pallas import tpu as pltpu

INPUT_DIM = 41
OUTPUT_DIM = 2


def _round_up(x, m):
    return ((x + m - 1) // m) * m


def _tpu_generation():
    """Best-effort TPU generation from device_kind; perf-only (never affects
    correctness)."""
    try:
        kind = jax.devices()[0].device_kind.lower()
    except Exception:
        return 6
    for g in (7, 6, 5, 4, 3, 2):
        if (f"v{g}" in kind) or (f"tpu{g}" in kind):
            return g
    return 6


def packed_linear_kernel(x_ref, w_ref, b_ref, o_ref):
    # x_ref: (TBp, D_in*p)   -- one packed batch tile
    # w_ref: (D_in*p, D_out*p) -- block-diagonal W^T, resident across the grid
    # b_ref: (1, D_out*p)      -- f32 bias tiled p times, resident
    # o_ref: (TBp, D_out*p)
    # Feed refs straight to the MXU; only the accumulator is forced to f32.
    y = jnp.dot(x_ref[...], w_ref[...], preferred_element_type=jnp.float32)
    o_ref[...] = (y + b_ref[...]).astype(o_ref.dtype)


def logistic_regression_forward(x, w, b, *, block_batch=None, pack=None):
    """x: [B, input_dim]; w: [output_dim, input_dim]; b: [output_dim]."""
    B, D_in = x.shape
    D_out = w.shape[0]

    gen = _tpu_generation()
    mxu_k = 128 if gen <= 5 else 256  # MXU K-depth: 128 up to v5, 256 on v6e/v7x

    # --- pack factor: largest p with 41*p <= MXU depth that divides B ---
    if pack is None:
        pack = 1
        for cand in (6, 5, 4, 3, 2):
            if D_in * cand <= mxu_k and B % cand == 0:
                pack = cand
                break
    p = int(pack)
    assert B % p == 0, "pack factor must divide the batch"

    rows = B // p          # packed rows
    K = D_in * p           # packed contraction dim (123 or 246 typically)
    N = D_out * p          # packed output dim

    # --- layout plumbing in plain JAX (cheap: bitcast reshape + tiny consts) ---
    x_pk = x.reshape(rows, K)                                        # row-major, free
    w_blk = jnp.kron(jnp.eye(p, dtype=w.dtype), w.T).astype(x.dtype)  # (K, N) block-diag
    b_pk = jnp.tile(b.astype(jnp.float32), p).reshape(1, N)          # (1, N) f32

    # --- tile size (in packed rows), generation-aware + VMEM-budgeted ---
    if block_batch is None:
        block_batch = 32768 if gen >= 7 else (16384 if gen == 6 else 8192)
    tbp = max(8, _round_up(max(1, block_batch) // p, 8))

    # Cap so double-buffered x + out tiles stay under ~12 MiB (safe on every
    # generation's default scoped VMEM, including the p = 1 fallback).
    itemsize = jnp.dtype(x.dtype).itemsize
    row_bytes = (_round_up(K, 128) + _round_up(N, 128)) * itemsize
    tbp = min(tbp, max(8, ((12 << 20) // (2 * row_bytes)) // 8 * 8))

    if rows <= 8:
        # Single full-extent block (always a legal block shape).
        tbp = rows
    else:
        # At least two grid steps when possible -> both v7x TCs get work.
        tbp = min(tbp, _round_up(pl.cdiv(rows, 2), 8))

    grid = (pl.cdiv(rows, tbp),)

    out_pk = pl.pallas_call(
        packed_linear_kernel,
        out_shape=jax.ShapeDtypeStruct((rows, N), x.dtype),
        grid_spec=pl.GridSpec(
            grid=grid,
            in_specs=[
                # packed x: tiled over the (packed) batch axis, ragged last block OK
                pl.BlockSpec((tbp, K), lambda i: (i, 0)),
                # block-diagonal W^T and bias: constant index_map -> VMEM-resident
                pl.BlockSpec((K, N), lambda i: (0, 0)),
                pl.BlockSpec((1, N), lambda i: (0, 0)),
            ],
            out_specs=pl.BlockSpec((tbp, N), lambda i: (i, 0)),
        ),
        compiler_params=pltpu.CompilerParams(
            dimension_semantics=("parallel",),
        ),
    )(x_pk, w_blk, b_pk)

    # (rows, D_out*p) -> (B, D_out): contiguous row-major un-packing, free.
    return out_pk.reshape(B, D_out)


if __name__ == "__main__":
    key = jax.random.PRNGKey(0)
    kx, kw, kb, kx2, kx3 = jax.random.split(key, 5)

    # Deterministic synthetic parameters (shapes from nn.Linear(41, 2)).
    bound = 1.0 / (INPUT_DIM ** 0.5)  # mimic torch Linear init range
    w = jax.random.uniform(kw, (OUTPUT_DIM, INPUT_DIM), dtype=jnp.float32,
                           minval=-bound, maxval=bound)
    b = jax.random.uniform(kb, (OUTPUT_DIM,), dtype=jnp.float32,
                           minval=-bound, maxval=bound)

    # 1) Small batch (original toy case) -> single full-extent block.
    batch = 8
    x = jax.random.normal(kx, (batch, INPUT_DIM), dtype=jnp.float32)
    out = jax.block_until_ready(logistic_regression_forward(x, w, b))
    ref = x @ w.T + b
    assert out.shape == (batch, OUTPUT_DIM)
    assert jnp.allclose(out, ref, atol=2e-5, rtol=2e-5)

    # 2) Larger batch -> packed rows, multi-step ragged grid (no jnp.pad).
    batch2 = 300
    x2 = jax.random.normal(kx2, (batch2, INPUT_DIM), dtype=jnp.float32)
    out2 = jax.block_until_ready(logistic_regression_forward(x2, w, b))
    ref2 = x2 @ w.T + b
    assert out2.shape == (batch2, OUTPUT_DIM)
    assert jnp.allclose(out2, ref2, atol=2e-5, rtol=2e-5)

    # 3) Awkward batch (prime, < 8 rows) -> exercises the p = 1 fallback path.
    batch3 = 7
    x3 = jax.random.normal(kx3, (batch3, INPUT_DIM), dtype=jnp.float32)
    out3 = jax.block_until_ready(logistic_regression_forward(x3, w, b))
    ref3 = x3 @ w.T + b
    assert out3.shape == (batch3, OUTPUT_DIM)
    assert jnp.allclose(out3, ref3, atol=2e-5, rtol=2e-5)

    print("KERNEL_OK")
</pallas_src>

<mosaic_0001>
module attributes {stable_mosaic.version = 11 : i64} {
  func.func @packed_linear_kernel(%arg0: i32, %arg1: memref<2x164xf32, #tpu.memory_space<vmem>>, %arg2: memref<164x8xf32, #tpu.memory_space<vmem>>, %arg3: memref<1x8xf32, #tpu.memory_space<vmem>>, %arg4: memref<2x8xf32, #tpu.memory_space<vmem>>) attributes {dimension_semantics = [#tpu.dimension_semantics<parallel>], iteration_bounds = array<i64: 1>, scalar_prefetch = 0 : i64, scratch_operands = 0 : i64, tpu.core_type = #tpu.core_type<tc>, window_params = [{transform_indices = @transform_0, window_bounds = array<i64: 2, 164>}, {pipeline_mode = #tpu.pipeline_mode<synchronous>, transform_indices = @transform_1, window_bounds = array<i64: 164, 8>}, {pipeline_mode = #tpu.pipeline_mode<synchronous>, transform_indices = @transform_2, window_bounds = array<i64: 1, 8>}, {transform_indices = @transform_3, window_bounds = array<i64: 2, 8>}]} {
    %c0 = arith.constant 0 : index
    %c0_0 = arith.constant 0 : index
    %0 = vector.load %arg1[%c0, %c0_0] : memref<2x164xf32, #tpu.memory_space<vmem>>, vector<2x164xf32>
    %c0_1 = arith.constant 0 : index
    %c0_2 = arith.constant 0 : index
    %1 = vector.load %arg2[%c0_1, %c0_2] : memref<164x8xf32, #tpu.memory_space<vmem>>, vector<164x8xf32>
    %cst = arith.constant dense<0.000000e+00> : vector<2x8xf32>
    %2 = tpu.matmul %0, %1, %cst {dimension_numbers = #tpu.dot_dimension_numbers<[1], [0], [0], [1], [0, 0, 1, 1], [], []>} : vector<2x164xf32>, vector<164x8xf32>, vector<2x8xf32> -> vector<2x8xf32>
    %c0_3 = arith.constant 0 : index
    %c0_4 = arith.constant 0 : index
    %3 = vector.load %arg3[%c0_3, %c0_4] : memref<1x8xf32, #tpu.memory_space<vmem>>, vector<1x8xf32>
    %4 = vector.broadcast %3 : vector<1x8xf32> to vector<2x8xf32>
    %5 = arith.addf %2, %4 : vector<2x8xf32>
    %c0_5 = arith.constant 0 : index
    %c0_6 = arith.constant 0 : index
    %6 = vector.load %arg4[%c0_5, %c0_6] : memref<2x8xf32, #tpu.memory_space<vmem>>, vector<2x8xf32>
    tpu.vector_store %arg4[%c0_5, %c0_6], %5 {strides = array<i32>} : memref<2x8xf32, #tpu.memory_space<vmem>>, vector<2x8xf32>,
    return
  }
  func.func @transform_0(%arg0: i32) -> (i32, i32) {
    %c0_i32 = arith.constant 0 : i32
    %c0_i32_0 = arith.constant 0 : i32
    return %arg0, %c0_i32 : i32, i32
  }
  func.func @transform_1(%arg0: i32) -> (i32, i32) {
    %c0_i32 = arith.constant 0 : i32
    %c0_i32_0 = arith.constant 0 : i32
    %c0_i32_1 = arith.constant 0 : i32
    return %c0_i32, %c0_i32_0 : i32, i32
  }
  func.func @transform_2(%arg0: i32) -> (i32, i32) {
    %c0_i32 = arith.constant 0 : i32
    %c0_i32_0 = arith.constant 0 : i32
    %c0_i32_1 = arith.constant 0 : i32
    return %c0_i32, %c0_i32_0 : i32, i32
  }
  func.func @transform_3(%arg0: i32) -> (i32, i32) {
    %c0_i32 = arith.constant 0 : i32
    %c0_i32_0 = arith.constant 0 : i32
    return %arg0, %c0_i32 : i32, i32
  }
}

</mosaic_0001>

<bundles_post_ra>
// kernel: tpu_custom_call.1
= control target key start
LH: loop header
LB: loop body
LE: loop exit
PB: predicated region body
PF: predicated region fallthrough
CT: control target
= control target key end

     0   :  { %v175_v1 = vmov 0.0   ;;  %vm54_vm0 = vcmask 293888   ;;  %s290_s0 = inlined_call_operand.vmem [shape: f32[2,164], index: 0, kind: input, shape index: {}]   ;;  %s291_s1 = inlined_call_operand.vmem [shape: f32[164,8], index: 1, kind: input, shape index: {}]   ;;  %s292_s2 = inlined_call_operand.vmem [shape: f32[1,8], index: 2, kind: input, shape index: {}]   ;;  %s293_s3 = inlined_call_operand.hbm [shape: f32[2,8], index: 3, kind: output, shape index: {}]  }
   0x1   :  { %v31_v0 = vld [vmem:[%s291_s1 + $0x78] sm:$0xff]  ;;  %61 = vmatprep.subr.mxu0 %v175_v1  ;;  %v30_v2 = vld [vmem:[%s291_s1 + $0x70] sm:$0xff]  ;;  %v29_v3 = vld [vmem:[%s291_s1 + $0x68] sm:$0xff] }
   0x2   :  { %62 = vmatpush1.msra.mxu0 %v31_v0  ;;  %v28_v4 = vld [vmem:[%s291_s1 + $0x60] sm:$0xff]  ;;  %v27_v5 = vld [vmem:[%s291_s1 + $0x58] sm:$0xff] }
   0x3   :  { %63 = vmatprep.subr.mxu0 %v175_v1  ;;  %v148_v6 = vld.sshfl [vmem:[%s290_s0] sm:$0x33 pattern:$0x76325410] }
   0x4   :  { %64 = vmatpush1.msra.mxu0 %v30_v2  ;;  %v52_v7 = vcombine.high %v148_v6, %v148_v6 }
   0x5   :  { %65 = vmatprep.subr.mxu0 %v175_v1 }
   0x6   :  { %66 = vmatpush1.msra.mxu0 %v29_v3 }
   0x7   :  { %67 = vmatprep.subr.mxu0 %v175_v1 }
   0x8   :  { %68 = vmatpush1.msra.mxu0 %v28_v4 }
   0x9   :  { %8 = vsyncpa [#allocation3], 0  ;;  %69 = vmatprep.subr.mxu0 %v175_v1  ;;  %v26_v8 = vld [vmem:[%s291_s1 + $0x50] sm:$0xff]  ;;  %150 = vmatprep.mubr.msk.f32.mxu0 %vm54_vm0, %v52_v7  ;;  %v25_v9 = vld [vmem:[%s291_s1 + $0x48] sm:$0xff]  ;;  %vm57_vm1 = vcmask 1043456   ;;  %s176_s29 = smov [#allocation2]  }
   0xa   :  { %70 = vmatpush1.msra.mxu0 %v27_v5  ;;  %v24_v10 = vld [vmem:[%s291_s1 + $0x40] sm:$0xff]  ;;  %v23_v11 = vld [vmem:[%s291_s1 + $0x38] sm:$0xff]  ;;  %v22_v12 = vld [vmem:[%s291_s1 + $0x30] sm:$0xff]  ;;  %s139_s30 = sshll.u32 %s176_s29, 4  ;;  %vm131_vm2 = vcmask 58368   ;;  %s140_s30 = int_to_ptr.vmem [resolvable:$true] %s139_s30 }
   0xb   :  { %71 = vmatprep.subr.mxu0 %v175_v1  ;;  %v21_v13 = vld [vmem:[%s291_s1 + $0x28] sm:$0xff]  ;;  %v20_v14 = vld [vmem:[%s291_s1 + $0x20] sm:$0xff]  ;;  %v19_v15 = vld [vmem:[%s291_s1 + $0x18] sm:$0xff]  ;;  %s153_s4 = scalar_lea.vmem %s140_s30, 32  ;;  %p158_p1 = scmp.lt.s32.totalorder %s140_s30, %s140_s30 }
   0xc   :  { %72 = vmatpush1.msra.mxu0 %v26_v8  ;;  %v18_v16 = vld [vmem:[%s291_s1 + $0x10] sm:$0xff]  ;;  %v17_v17 = vld [vmem:[%s291_s1 + $0x8] sm:$0xff]  ;;  %v16_v18 = vld [vmem:[%s291_s1] sm:$0xff]  ;;  %p154_p0 = scmp.ne.s32.totalorder %s140_s30, %s153_s4  ;;  %p159_p2 = scmp.lt.s32.totalorder %s153_s4, %s153_s4 }
   0xd   :  { %73 = vmatprep.subr.mxu0 %v175_v1  ;;  %v36_v19 = vld [vmem:[%s291_s1 + $0xa0] sm:$0xf]  ;;  %v35_v20 = vld [vmem:[%s291_s1 + $0x98] sm:$0xff]  ;;  %v34_v21 = vld [vmem:[%s291_s1 + $0x90] sm:$0xff] }
   0xe   :  { %74 = vmatpush1.msra.mxu0 %v25_v9  ;;  %v33_v22 = vld [vmem:[%s291_s1 + $0x88] sm:$0xff]  ;;  %v32_v23 = vld [vmem:[%s291_s1 + $0x80] sm:$0xff]  ;;  %p160_p3 = por %p159_p2, %p158_p1 }
   0xf   :  { %75 = vmatprep.subr.mxu0 %v175_v1  ;;  %v147_v24 = vld [vmem:[%s292_s2] ss:$0 sm:$0xff] }
  0x10   :  { %76 = vmatpush1.msra.mxu0 %v24_v10  ;;  %p161_p4 = pnand %p160_p3, %p154_p0 }
  0x11   :  { %77 = vmatprep.subr.mxu0 %v175_v1 }
  0x12   :  { %78 = vmatpush1.msra.mxu0 %v23_v11 }
  0x13   :  { %79 = vmatprep.subr.mxu0 %v175_v1 }
  0x14   :  { %80 = vmatpush1.msra.mxu0 %v22_v12 }
  0x15   :  { %81 = vmatprep.subr.mxu0 %v175_v1 }
  0x16   :  { %82 = vmatpush1.msra.mxu0 %v21_v13 }
  0x17   :  { %83 = vmatprep.subr.mxu0 %v175_v1 }
  0x18   :  { %84 = vmatpush1.msra.mxu0 %v20_v14 }
  0x19   :  { %85 = vmatprep.subr.mxu0 %v175_v1 }
  0x1a   :  { %86 = vmatpush1.msra.mxu0 %v19_v15 }
  0x1b   :  { %87 = vmatprep.subr.mxu0 %v175_v1 }
  0x1c   :  { %88 = vmatpush1.msra.mxu0 %v18_v16 }
  0x1d   :  { %89 = vmatprep.subr.mxu0 %v175_v1 }
  0x1e   :  { %90 = vmatpush1.msra.mxu0 %v17_v17 }
  0x1f   :  { %91 = vmatprep.subr.mxu0 %v175_v1 }
  0x20   :  { %92 = vmatpush1.msra.mxu0 %v16_v18 }
  0x21   :  { %115 = vmatprep.subr.mxu0 %v175_v1 }
  0x22   :  { %149 = vmatpush2.msk.msra.mxu0 %vm57_vm1, %v36_v19 }
  0x23   :  { %117 = vmatprep.subr.mxu0 %v175_v1 }
  0x24   :  { %118 = vmatpush2.msra.mxu0 %v35_v20 }
  0x25   :  { %119 = vmatprep.subr.mxu0 %v175_v1 }
  0x26   :  { %120 = vmatpush2.msra.mxu0 %v34_v21 }
  0x27   :  { %121 = vmatprep.subr.mxu0 %v175_v1 }
  0x28   :  { %122 = vmatpush2.msra.mxu0 %v33_v22 }
  0x29   :  { %123 = vmatprep.subr.mxu0 %v175_v1 }
  0x2a   :  { %124 = vmatpush2.msra.mxu0 %v32_v23 }
  0x2b   :  { %126 = vmatmul.mubr.f32.vlgmr.msra.gmra.mxu0 %v148_v6 }
  0xeb   :  { %v127_v25 = vpop.f32.mrf.mxu0 }
  0xec   :  { %v128_v26 = vadd.f32 %v147_v24, %v127_v25 }
  0xed   :  { %v129_v27 = vpop.f32.mrf.mxu0 }
  0xee   :  { %132 = vst.msk [vmem:[#allocation2] sm:$0x3] %vm131_vm2, %v128_v26 }
  0xef   :  { %164 = shalt.err (!%p161_p4)
}
  0xf0   :  { %142 = dma.vmem_to_hbm [thread:$0]  %s140_s30, 32, %s293_s3, [#allocation3]  }
  0xf1   :  { %173 = dma.done.wait [#allocation3], 32  }
  0xf2   :  { %174 = vsyncadd [#allocation3], 4294967264 }
  0xf3   :  { %146 = vsyncpa [#allocation3], 1 }

</bundles_post_ra>
